<compile_context>
chip_gen: v7x
topology: tpu7x:2x2x1
jax: 0.10.0
libtpu: 0.0.40
codegen_flags: <defaults>
</compile_context>

<pallas_src>
import functools

import jax
import jax.numpy as jnp
from jax.experimental import pallas as pl
from jax.experimental.pallas import tpu as pltpu

LANE = 128
SUBLANE = 8
NEG_LARGE = -1e30  # logit for padded class lanes -> exp underflows to exactly 0


def _round_up(n, m):
    return ((n + m - 1) // m) * m


def mlp_kernel(x_ref, w1_ref, b1_ref, w2_ref, b2_ref, out_ref, *, num_classes):
    """Fused MLP forward on one batch tile.

    x_ref:  (TB, D_in)        input dtype (cast to bf16 in-kernel for the MXU)
    w1_ref: (D_in, H_pad)     bf16  (resident)
    b1_ref: (1, H_pad)        f32   (resident)
    w2_ref: (H_pad, C_pad)    bf16  (resident; ones-column + class padding folded in)
    b2_ref: (1, C_pad)        f32   (resident)
    out_ref:(TB, num_classes) f32   softmax probabilities
    """
    # Cast in-kernel: keeps the HBM read of x at its stored width and feeds the MXU bf16.
    x = x_ref[...].astype(jnp.bfloat16)

    # Hidden layer + ReLU (bf16 MXU matmul, f32 accumulate, lane-dense N = H_pad).
    h = jnp.dot(x, w1_ref[...], preferred_element_type=jnp.float32) + b1_ref[...]
    h = jnp.maximum(h, 0.0)

    # Augmented output layer: produces [1.0 | z | -1e30 pad] directly (N = C_pad).
    logits = jnp.dot(h.astype(jnp.bfloat16), w2_ref[...],
                     preferred_element_type=jnp.float32) + b2_ref[...]

    # Row softmax in f32.  Column 0 is the constant-1 logit, so the row max is >= 1 and
    # exp(NEG_LARGE - m) == 0 for the padded lanes -> they contribute nothing to denom.
    m = jnp.max(logits, axis=1, keepdims=True)
    e = jnp.exp(logits - m)
    denom = jnp.sum(e, axis=1, keepdims=True)
    probs = e / denom  # exact divide: rows sum to 1 within float rounding

    # Store only the real classes (full last dim of the output array).
    out_ref[...] = probs[:, :num_classes]


def mlp_forward(x, w1, b1, w2, b2, num_classes, *, tb=None):
    """x: (B, D_in); w1: (D_in, H); b1: (H,); w2: (H, num_classes-1); b2: (num_classes-1,)."""
    B, D_in = x.shape
    H = w1.shape[1]
    H_pad = _round_up(H, LANE)
    C_pad = _round_up(num_classes, LANE)

    # --- one-time parameter prep: pad, fold ones-column, bf16 matmul operands ---
    w1_p = jnp.zeros((D_in, H_pad), jnp.float32).at[:, :H].set(w1.astype(jnp.float32))
    w1_p = w1_p.astype(jnp.bfloat16)
    b1_p = jnp.zeros((1, H_pad), jnp.float32).at[:, :H].set(
        b1.reshape(1, -1).astype(jnp.float32))
    w2_aug = jnp.zeros((H_pad, C_pad), jnp.float32).at[:H, 1:num_classes].set(
        w2.astype(jnp.float32))
    w2_aug = w2_aug.astype(jnp.bfloat16)
    b2_aug = jnp.full((1, C_pad), NEG_LARGE, jnp.float32)
    b2_aug = b2_aug.at[0, 0].set(1.0)  # the hstack'd ones column, as a pure-bias logit
    b2_aug = b2_aug.at[0, 1:num_classes].set(b2.reshape(-1).astype(jnp.float32))

    # --- batch tiling ---
    if tb is None:
        if B <= 512:
            # Small batch: one grid step.  Splitting tiny batches only adds ~0.35us/step
            # overhead and extra DMA pairs (single-TC chips gain nothing from more steps).
            tb = _round_up(B, SUBLANE)
        else:
            # Large batch: 512-1024-row tiles (~85% of HBM roofline vs ~63% at 256),
            # capped at ceil(B/2) so the "parallel" axis has >= 2 steps for v7x's 2 TCs.
            tb = min(1024, _round_up(pl.cdiv(B, 2), SUBLANE))
    tb = max(SUBLANE, min(_round_up(tb, SUBLANE), _round_up(B, SUBLANE)))
    grid = (pl.cdiv(B, tb),)

    kernel = functools.partial(mlp_kernel, num_classes=num_classes)

    return pl.pallas_call(
        kernel,
        out_shape=jax.ShapeDtypeStruct((B, num_classes), jnp.float32),
        grid=grid,
        in_specs=[
            pl.BlockSpec((tb, D_in), lambda i: (i, 0)),      # x: batch-tiled, pipelined
            pl.BlockSpec((D_in, H_pad), lambda i: (0, 0)),   # w1: resident
            pl.BlockSpec((1, H_pad), lambda i: (0, 0)),      # b1: resident
            pl.BlockSpec((H_pad, C_pad), lambda i: (0, 0)),  # w2_aug: resident
            pl.BlockSpec((1, C_pad), lambda i: (0, 0)),      # b2_aug: resident
        ],
        out_specs=pl.BlockSpec((tb, num_classes), lambda i: (i, 0)),
        compiler_params=pltpu.CompilerParams(dimension_semantics=("parallel",)),
    )(x, w1_p, b1_p, w2_aug, b2_aug)


def reference_forward(x, w1, b1, w2, b2):
    """Pure-JAX f32 reference matching the PyTorch module semantics."""
    h = jax.nn.relu(x @ w1 + b1)
    z = h @ w2 + b2
    logits = jnp.concatenate([jnp.ones((x.shape[0], 1), jnp.float32), z], axis=1)
    return jax.nn.softmax(logits, axis=1)


if __name__ == "__main__":
    # Small shapes consistent with the module.
    batch = 64
    input_size = 32
    hidden_size = 32
    num_classes = 5  # output layer has num_classes - 1 = 4 units

    key = jax.random.PRNGKey(0)
    kx, kw1, kb1, kw2, kb2 = jax.random.split(key, 5)

    x = jax.random.normal(kx, (batch, input_size), dtype=jnp.float32)

    # Deterministic parameter init (kaiming-uniform-ish scale, like nn.Linear defaults).
    w1 = jax.random.uniform(kw1, (input_size, hidden_size), jnp.float32,
                            minval=-1.0, maxval=1.0) / jnp.sqrt(input_size)
    b1 = jax.random.uniform(kb1, (hidden_size,), jnp.float32,
                            minval=-1.0, maxval=1.0) / jnp.sqrt(input_size)
    w2 = jax.random.uniform(kw2, (hidden_size, num_classes - 1), jnp.float32,
                            minval=-1.0, maxval=1.0) / jnp.sqrt(hidden_size)
    b2 = jax.random.uniform(kb2, (num_classes - 1,), jnp.float32,
                            minval=-1.0, maxval=1.0) / jnp.sqrt(hidden_size)

    # Default tiling: single grid step for this small batch (recommended small-B path).
    probs = jax.block_until_ready(mlp_forward(x, w1, b1, w2, b2, num_classes))
    # Also exercise the multi-step batch-grid path (tb=16 -> grid=(4,)).
    probs_tiled = jax.block_until_ready(
        mlp_forward(x, w1, b1, w2, b2, num_classes, tb=16))

    ref = reference_forward(x, w1, b1, w2, b2)
    assert probs.shape == (batch, num_classes)
    assert probs_tiled.shape == (batch, num_classes)
    # bf16 matmul inputs (f32 accumulate) -> compare to the f32 reference loosely ...
    assert jnp.allclose(probs, ref, atol=2e-2, rtol=2e-2), "mismatch vs reference"
    assert jnp.allclose(probs_tiled, ref, atol=2e-2, rtol=2e-2), "tiled mismatch vs reference"
    # ... but normalization is exact (plain divide), so rows sum to 1 tightly.
    assert jnp.allclose(jnp.sum(probs, axis=1), 1.0, atol=1e-5), "rows must sum to 1"
    assert jnp.allclose(jnp.sum(probs_tiled, axis=1), 1.0, atol=1e-5), "rows must sum to 1"

    print("KERNEL_OK")
</pallas_src>

<mosaic_0001>
module attributes {stable_mosaic.version = 11 : i64} {
  func.func @mlp_kernel(%arg0: i32, %arg1: memref<64x32xf32, #tpu.memory_space<vmem>>, %arg2: memref<32x128xbf16, #tpu.memory_space<vmem>>, %arg3: memref<1x128xf32, #tpu.memory_space<vmem>>, %arg4: memref<128x128xbf16, #tpu.memory_space<vmem>>, %arg5: memref<1x128xf32, #tpu.memory_space<vmem>>, %arg6: memref<64x5xf32, #tpu.memory_space<vmem>>) attributes {dimension_semantics = [#tpu.dimension_semantics<parallel>], iteration_bounds = array<i64: 1>, scalar_prefetch = 0 : i64, scratch_operands = 0 : i64, tpu.core_type = #tpu.core_type<tc>, window_params = [{transform_indices = @transform_0, window_bounds = array<i64: 64, 32>}, {pipeline_mode = #tpu.pipeline_mode<synchronous>, transform_indices = @transform_1, window_bounds = array<i64: 32, 128>}, {pipeline_mode = #tpu.pipeline_mode<synchronous>, transform_indices = @transform_2, window_bounds = array<i64: 1, 128>}, {pipeline_mode = #tpu.pipeline_mode<synchronous>, transform_indices = @transform_3, window_bounds = array<i64: 128, 128>}, {pipeline_mode = #tpu.pipeline_mode<synchronous>, transform_indices = @transform_4, window_bounds = array<i64: 1, 128>}, {transform_indices = @transform_5, window_bounds = array<i64: 64, 5>}]} {
    %c0 = arith.constant 0 : index
    %c0_0 = arith.constant 0 : index
    %0 = vector.load %arg1[%c0, %c0_0] : memref<64x32xf32, #tpu.memory_space<vmem>>, vector<64x32xf32>
    %1 = arith.truncf %0 : vector<64x32xf32> to vector<64x32xbf16>
    %c0_1 = arith.constant 0 : index
    %c0_2 = arith.constant 0 : index
    %2 = vector.load %arg2[%c0_1, %c0_2] : memref<32x128xbf16, #tpu.memory_space<vmem>>, vector<32x128xbf16>
    %cst = arith.constant dense<0.000000e+00> : vector<64x128xf32>
    %3 = tpu.matmul %1, %2, %cst {dimension_numbers = #tpu.dot_dimension_numbers<[1], [0], [0], [1], [0, 0, 1, 1], [], []>} : vector<64x32xbf16>, vector<32x128xbf16>, vector<64x128xf32> -> vector<64x128xf32>
    %c0_3 = arith.constant 0 : index
    %c0_4 = arith.constant 0 : index
    %4 = vector.load %arg3[%c0_3, %c0_4] : memref<1x128xf32, #tpu.memory_space<vmem>>, vector<1x128xf32>
    %5 = vector.broadcast %4 : vector<1x128xf32> to vector<64x128xf32>
    %6 = arith.addf %3, %5 : vector<64x128xf32>
    %cst_5 = arith.constant 0.000000e+00 : f32
    %7 = vector.broadcast %cst_5 : f32 to vector<64x128xf32>
    %8 = arith.maximumf %6, %7 : vector<64x128xf32>
    %9 = arith.truncf %8 : vector<64x128xf32> to vector<64x128xbf16>
    %c0_6 = arith.constant 0 : index
    %c0_7 = arith.constant 0 : index
    %10 = vector.load %arg4[%c0_6, %c0_7] : memref<128x128xbf16, #tpu.memory_space<vmem>>, vector<128x128xbf16>
    %cst_8 = arith.constant dense<0.000000e+00> : vector<64x128xf32>
    %11 = tpu.matmul %9, %10, %cst_8 {dimension_numbers = #tpu.dot_dimension_numbers<[1], [0], [0], [1], [0, 0, 1, 1], [], []>} : vector<64x128xbf16>, vector<128x128xbf16>, vector<64x128xf32> -> vector<64x128xf32>
    %c0_9 = arith.constant 0 : index
    %c0_10 = arith.constant 0 : index
    %12 = vector.load %arg5[%c0_9, %c0_10] : memref<1x128xf32, #tpu.memory_space<vmem>>, vector<1x128xf32>
    %13 = vector.broadcast %12 : vector<1x128xf32> to vector<64x128xf32>
    %14 = arith.addf %11, %13 : vector<64x128xf32>
    %cst_11 = arith.constant dense<0xFF800000> : vector<64xf32>
    %15 = vector.multi_reduction <maximumf>, %14, %cst_11 [1] : vector<64x128xf32> to vector<64xf32>
    %16 = vector.shape_cast %15 : vector<64xf32> to vector<64x1xf32>
    %17 = vector.broadcast %16 : vector<64x1xf32> to vector<64x128xf32>
    %18 = arith.subf %14, %17 : vector<64x128xf32>
    %19 = math.exp %18 : vector<64x128xf32>
    %cst_12 = arith.constant dense<0.000000e+00> : vector<64xf32>
    %20 = vector.multi_reduction <add>, %19, %cst_12 [1] : vector<64x128xf32> to vector<64xf32>
    %21 = vector.shape_cast %20 : vector<64xf32> to vector<64x1xf32>
    %22 = vector.broadcast %21 : vector<64x1xf32> to vector<64x128xf32>
    %23 = arith.divf %19, %22 : vector<64x128xf32>
    %24 = vector.extract_strided_slice %23 {offsets = [0, 0], sizes = [64, 5], strides = [1, 1]} : vector<64x128xf32> to vector<64x5xf32>
    %c0_13 = arith.constant 0 : index
    %c0_14 = arith.constant 0 : index
    %25 = vector.load %arg6[%c0_13, %c0_14] : memref<64x5xf32, #tpu.memory_space<vmem>>, vector<64x5xf32>
    tpu.vector_store %arg6[%c0_13, %c0_14], %24 {strides = array<i32>} : memref<64x5xf32, #tpu.memory_space<vmem>>, vector<64x5xf32>,
    return
  }
  func.func @transform_0(%arg0: i32) -> (i32, i32) {
    %c0_i32 = arith.constant 0 : i32
    %c0_i32_0 = arith.constant 0 : i32
    return %arg0, %c0_i32 : i32, i32
  }
  func.func @transform_1(%arg0: i32) -> (i32, i32) {
    %c0_i32 = arith.constant 0 : i32
    %c0_i32_0 = arith.constant 0 : i32
    %c0_i32_1 = arith.constant 0 : i32
    return %c0_i32, %c0_i32_0 : i32, i32
  }
  func.func @transform_2(%arg0: i32) -> (i32, i32) {
    %c0_i32 = arith.constant 0 : i32
    %c0_i32_0 = arith.constant 0 : i32
    %c0_i32_1 = arith.constant 0 : i32
    return %c0_i32, %c0_i32_0 : i32, i32
  }
  func.func @transform_3(%arg0: i32) -> (i32, i32) {
    %c0_i32 = arith.constant 0 : i32
    %c0_i32_0 = arith.constant 0 : i32
    %c0_i32_1 = arith.constant 0 : i32
    return %c0_i32, %c0_i32_0 : i32, i32
  }
  func.func @transform_4(%arg0: i32) -> (i32, i32) {
    %c0_i32 = arith.constant 0 : i32
    %c0_i32_0 = arith.constant 0 : i32
    %c0_i32_1 = arith.constant 0 : i32
    return %c0_i32, %c0_i32_0 : i32, i32
  }
  func.func @transform_5(%arg0: i32) -> (i32, i32) {
    %c0_i32 = arith.constant 0 : i32
    %c0_i32_0 = arith.constant 0 : i32
    return %arg0, %c0_i32 : i32, i32
  }
}

</mosaic_0001>

<bundles_post_ra>
// kernel: tpu_custom_call.1
= control target key start
LH: loop header
LB: loop body
LE: loop exit
PB: predicated region body
PF: predicated region fallthrough
CT: control target
= control target key end

     0   :  { %vm56_vm0 = vcmask 261120   ;;  %vm354_vm1 = vcmask 39936   ;;  %s605_s1 = inlined_call_operand.vmem [shape: bf16[32,128], index: 1, kind: input, shape index: {}]   ;;  %s606_s0 = inlined_call_operand.vmem [shape: f32[64,32], index: 0, kind: input, shape index: {}]   ;;  %s607_s3 = inlined_call_operand.vmem [shape: bf16[128,128], index: 3, kind: input, shape index: {}]   ;;  %s608_s2 = inlined_call_operand.vmem [shape: f32[1,128], index: 2, kind: input, shape index: {}]   ;;  %s609_s4 = inlined_call_operand.vmem [shape: f32[1,128], index: 4, kind: input, shape index: {}]   ;;  %s610_s5 = inlined_call_operand.vmem [shape: f32[64,5], index: 5, kind: output, shape index: {}]  }
   0x1   :  { %v437_v0 = vld [vmem:[%s605_s1] sm:$0xff]   ;;  %v438_v1 = vld [vmem:[%s605_s1 + $0x8] sm:$0xff]   ;;  %v23_v5 = vld [vmem:[%s606_s0 + $0x10] sm:$0xff] }
   0x2   :  { %401 = vmatprep.subr.bf16.mxu0 %v437_v0  ;;  %v21_v2 = vld [vmem:[%s606_s0] sm:$0xff]  ;;  %v22_v3 = vld [vmem:[%s606_s0 + $0x8] sm:$0xff]  ;;  %v24_v6 = vld [vmem:[%s606_s0 + $0x18] sm:$0xff] }
   0x3   :  { %402 = vmatpush3.bf16.msra.mxu0 %v437_v0  ;;  %v29_v4 = vpack.c.bf16 %v22_v3, %v21_v2  ;;  %v25_v7 = vld [vmem:[%s606_s0 + $0x20] sm:$0xff]  ;;  %v26_v8 = vld [vmem:[%s606_s0 + $0x28] sm:$0xff]  ;;  %v30_v10 = vpack.c.bf16 %v24_v6, %v23_v5  ;;  %v27_v13 = vld [vmem:[%s606_s0 + $0x30] sm:$0xff] }
   0x4   :  { %403 = vmatprep.subr.bf16.mxu0 %v438_v1  ;;  %v439_v9 = vld [vmem:[%s607_s3] sm:$0xff]   ;;  %v440_v11 = vld [vmem:[%s607_s3 + $0x8] sm:$0xff]   ;;  %v31_v12 = vpack.c.bf16 %v26_v8, %v25_v7  ;;  %v441_v14 = vld [vmem:[%s607_s3 + $0x10] sm:$0xff]  }
   0x5   :  { %405 = vmatprep.mubr.msk.bf16.mxu0 %vm56_vm0, %v29_v4  ;;  %413 = vmatprep.subr.bf16.mxu1 %v439_v9  ;;  %v28_v15 = vld [vmem:[%s606_s0 + $0x38] sm:$0xff]  ;;  %v443_v18 = vld [vmem:[%s607_s3 + $0x20] sm:$0xff]   ;;  %v444_v19 = vld [vmem:[%s607_s3 + $0x28] sm:$0xff]  }
   0x6   :  { %414 = vmatpush3.bf16.msra.mxu1 %v439_v9  ;;  %v442_v16 = vld [vmem:[%s607_s3 + $0x18] sm:$0xff]   ;;  %v32_v17 = vpack.c.bf16 %v28_v15, %v27_v13  ;;  %v445_v20 = vld [vmem:[%s607_s3 + $0x30] sm:$0xff]   ;;  %v367_v22 = vld [vmem:[%s608_s2] ss:$0 sm:$0xff] }
   0x7   :  { %404 = vmatpush3.bf16.msra.mxu0 %v438_v1  ;;  %415 = vmatprep.subr.bf16.mxu1 %v440_v11  ;;  %v446_v21 = vld [vmem:[%s607_s3 + $0x38] sm:$0xff]   ;;  %v374_v51 = vld [vmem:[%s609_s4] ss:$0 sm:$0xff] }
   0xa   :  { %406 = vmatmul.mubr.msk.bf16.vlgmr.msra.gmra.mrb[0].mxu0 %vm56_vm0, %v30_v10  ;;  %416 = vmatpush3.bf16.msra.mxu1 %v440_v11 }
   0xb   :  { %409 = vmatprep.mubr.msk.bf16.mxu0 %vm56_vm0, %v31_v12  ;;  %417 = vmatprep.subr.bf16.mxu1 %v441_v14 }
   0xe   :  { %418 = vmatpush3.bf16.msra.mxu1 %v441_v14 }
   0xf   :  { %419 = vmatprep.subr.bf16.mxu1 %v442_v16 }
  0x12   :  { %410 = vmatmul.mubr.msk.bf16.gmra.mrb[4].mxu0 %vm56_vm0, %v32_v17  ;;  %420 = vmatpush3.bf16.msra.mxu1 %v442_v16 }
  0x13   :  { %421 = vmatprep.subr.bf16.mxu1 %v443_v18 }
  0x16   :  { %422 = vmatpush3.bf16.msra.mxu1 %v443_v18 }
  0x17   :  { %423 = vmatprep.subr.bf16.mxu1 %v444_v19 }
  0x1a   :  { %424 = vmatpush3.bf16.msra.mxu1 %v444_v19 }
  0x1b   :  { %425 = vmatprep.subr.bf16.mxu1 %v445_v20 }
  0x1e   :  { %426 = vmatpush3.bf16.msra.mxu1 %v445_v20 }
  0x1f   :  { %427 = vmatprep.subr.bf16.mxu1 %v446_v21 }
  0x22   :  { %428 = vmatpush3.bf16.msra.mxu1 %v446_v21 }
  0xdd   :  { %v407_v23 = vpop.f32.mrb[0].mxu0 }
  0xde   :  { %v112_v24 = vadd.f32 %v407_v23, %v367_v22  ;;  %v103_v25 = vpop.f32.mrb[1].mxu0 }
  0xdf   :  { %v104_v26 = vadd.f32 %v367_v22, %v103_v25  ;;  %v408_v27 = vpop.f32.mrb[2].mxu0 }
  0xe0   :  { %v115_v28 = vadd.f32 %v408_v27, %v367_v22  ;;  %v106_v29 = vpop.f32.mrb[3].mxu0  ;;  %v136_v31 = vmax.f32 %v112_v24, 0.0 }
  0xe1   :  { %v107_v30 = vadd.f32 %v367_v22, %v106_v29  ;;  %v134_v33 = vmax.f32 %v104_v26, 0.0 }
  0xe2   :  { %v137_v32 = vmax.f32 %v115_v28, 0.0 }
  0xe3   :  { %v135_v34 = vmax.f32 %v107_v30, 0.0 }
  0xe4   :  { %v143_v35 = vpack.c.bf16 %v137_v32, %v136_v31 }
  0xe5   :  { %v411_v36 = vpop.f32.mrb[4].mxu0  ;;  %v142_v37 = vpack.c.bf16 %v135_v34, %v134_v33 }
  0xe6   :  { %v128_v38 = vadd.f32 %v411_v36, %v367_v22  ;;  %v119_v39 = vpop.f32.mrb[5].mxu0 }
  0xe7   :  { %v120_v40 = vadd.f32 %v367_v22, %v119_v39  ;;  %v412_v41 = vpop.f32.mrb[6].mxu0  ;;  %429 = vmatprep.mubr.bf16.mxu1 %v142_v37 }
  0xe8   :  { %v140_v42 = vmax.f32 %v128_v38, 0.0  ;;  %v131_v43 = vadd.f32 %v412_v41, %v367_v22  ;;  %v122_v44 = vpop.f32.mrb[7].mxu0  ;;  %430 = vmatmul.mubr.bf16.vlgmr.msra.gmra.mrb[0].mxu1 %v143_v35 }
  0xe9   :  { %v123_v45 = vadd.f32 %v367_v22, %v122_v44  ;;  %v138_v47 = vmax.f32 %v120_v40, 0.0 }
  0xea   :  { %v141_v46 = vmax.f32 %v131_v43, 0.0 }
  0xeb   :  { %v139_v48 = vmax.f32 %v123_v45, 0.0 }
  0xec   :  { %v145_v49 = vpack.c.bf16 %v141_v46, %v140_v42 }
  0xed   :  { %v144_v50 = vpack.c.bf16 %v139_v48, %v138_v47 }
  0xef   :  { %433 = vmatprep.mubr.bf16.mxu1 %v144_v50 }
  0xf0   :  { %434 = vmatmul.mubr.bf16.gmra.mrb[4].mxu1 %v145_v49 }
 0x1bb   :  { %v431_v52 = vpop.f32.mrb[0].mxu1 }
 0x1bc   :  { %v260_v53 = vadd.f32 %v431_v52, %v374_v51  ;;  %v251_v54 = vpop.f32.mrb[1].mxu1 }
 0x1bd   :  { %v252_v55 = vadd.f32 %v374_v51, %v251_v54  ;;  %v432_v56 = vpop.f32.mrb[2].mxu1 }
 0x1be   :  { %286 = vmax.xlane.f32.xlu1 %v260_v53  ;;  %v254_v57 = vpop.f32.mrb[3].mxu1  ;;  %v263_v58 = vadd.f32 %v432_v56, %v374_v51 }
 0x1bf   :  { %282 = vmax.xlane.f32.xlu0 %v252_v55  ;;  %v255_v59 = vadd.f32 %v374_v51, %v254_v57 }
 0x1c2   :  { %288 = vmax.xlane.f32.xlu1 %v263_v58 }
 0x1c3   :  { %v435_v60 = vpop.f32.mrb[4].mxu1  ;;  %284 = vmax.xlane.f32.xlu0 %v255_v59 }
 0x1c4   :  { %v267_v61 = vpop.f32.mrb[5].mxu1  ;;  %v276_v2 = vadd.f32 %v435_v60, %v374_v51 }
 0x1c5   :  { %v268_v62 = vadd.f32 %v374_v51, %v267_v61  ;;  %v436_v63 = vpop.f32.mrb[6].mxu1 }
 0x1c6   :  { %v270_v0 = vpop.f32.mrb[7].mxu1  ;;  %v279_v3 = vadd.f32 %v436_v63, %v374_v51 }
 0x1c7   :  { %v271_v1 = vadd.f32 %v374_v51, %v270_v0  ;;  %290 = vmax.xlane.f32.xlu0 %v268_v62 }
 0x1c9   :  { %292 = vmax.xlane.f32.xlu1 %v271_v1 }
 0x1cb   :  { %294 = vmax.xlane.f32.xlu0 %v276_v2 }
 0x1cd   :  { %296 = vmax.xlane.f32.xlu1 %v279_v3 }
 0x24b   :  { %v287_v4 = vpop.xlane.xlu1 %286 }
 0x24c   :  { %v300_v5 = vsub.f32 %v260_v53, %v287_v4  ;;  %v283_v6 = vpop.xlane.xlu0 %282 }
 0x24d   :  { %v298_v7 = vsub.f32 %v252_v55, %v283_v6 }
 0x24e   :  { %v310_v8 = vmul.f32 1.442695, %v300_v5 }
 0x24f   :  { %v306_v9 = vmul.f32 1.442695, %v298_v7  ;;  %v289_v10 = vpop.xlane.xlu1 %288 }
 0x250   :  { %447 = vpow2.f32 %v310_v8  ;;  %v301_v11 = vsub.f32 %v263_v58, %v289_v10  ;;  %v285_v12 = vpop.xlane.xlu0 %284 }
 0x251   :  { %v299_v13 = vsub.f32 %v255_v59, %v285_v12  ;;  %449 = vpow2.f32 %v306_v9 }
 0x252   :  { %v312_v14 = vmul.f32 1.442695, %v301_v11 }
 0x253   :  { %v308_v15 = vmul.f32 1.442695, %v299_v13 }
 0x254   :  { %451 = vpow2.f32 %v312_v14  ;;  %v291_v16 = vpop.xlane.xlu0 %290 }
 0x255   :  { %v302_v17 = vsub.f32 %v268_v62, %v291_v16  ;;  %453 = vpow2.f32 %v308_v15 }
 0x256   :  { %v293_v18 = vpop.xlane.xlu1 %292 }
 0x257   :  { %v314_v19 = vmul.f32 1.442695, %v302_v17  ;;  %v303_v20 = vsub.f32 %v271_v1, %v293_v18 }
 0x258   :  { %v295_v21 = vpop.xlane.xlu0 %294 }
 0x259   :  { %455 = vpow2.f32 %v314_v19  ;;  %v316_v22 = vmul.f32 1.442695, %v303_v20  ;;  %v304_v23 = vsub.f32 %v276_v2, %v295_v21 }
 0x25a   :  { %v448_v24 = vpop.eup %447  ;;  %v297_v25 = vpop.xlane.xlu1 %296 }
 0x25b   :  { %457 = vpow2.f32 %v316_v22  ;;  %v318_v26 = vmul.f32 1.442695, %v304_v23  ;;  %v305_v27 = vsub.f32 %v279_v3, %v297_v25  ;;  %326 = vadd.xlane.f32.xlu0 %v448_v24  ;;  %v450_v28 = vpop.eup %449 }
 0x25d   :  { %459 = vpow2.f32 %v318_v26  ;;  %v320_v29 = vmul.f32 1.442695, %v305_v27 }
 0x25e   :  { %v452_v30 = vpop.eup %451 }
 0x25f   :  { %461 = vpow2.f32 %v320_v29  ;;  %328 = vadd.xlane.f32.xlu1 %v452_v30  ;;  %322 = vadd.xlane.f32.xlu0 %v450_v28  ;;  %v454_v31 = vpop.eup %453 }
 0x263   :  { %v456_v32 = vpop.eup %455  ;;  %324 = vadd.xlane.f32.xlu1 %v454_v31 }
 0x264   :  { %330 = vadd.xlane.f32.xlu0 %v456_v32 }
 0x265   :  { %v458_v33 = vpop.eup %457 }
 0x267   :  { %v460_v34 = vpop.eup %459  ;;  %332 = vadd.xlane.f32.xlu1 %v458_v33 }
 0x268   :  { %334 = vadd.xlane.f32.xlu0 %v460_v34 }
 0x269   :  { %v462_v35 = vpop.eup %461 }
 0x26b   :  { %336 = vadd.xlane.f32.xlu1 %v462_v35 }
 0x2e8   :  { %v327_v36 = vpop.xlane.xlu0 %326 }
 0x2e9   :  { %463 = vrcp.f32 %v327_v36 }
 0x2ec   :  { %v329_v37 = vpop.xlane.xlu1 %328  ;;  %v323_v38 = vpop.xlane.xlu0 %322 }
 0x2ed   :  { %465 = vrcp.f32 %v329_v37 }
 0x2ee   :  { %467 = vrcp.f32 %v323_v38 }
 0x2f0   :  { %v325_v39 = vpop.xlane.xlu1 %324 }
 0x2f1   :  { %469 = vrcp.f32 %v325_v39  ;;  %v331_v40 = vpop.xlane.xlu0 %330 }
 0x2f2   :  { %471 = vrcp.f32 %v331_v40 }
 0x2f3   :  { %v464_v41 = vpop.eup %463 }
 0x2f4   :  { %v343_v42 = vmul.f32 %v464_v41, %v448_v24  ;;  %v333_v43 = vpop.xlane.xlu1 %332 }
 0x2f5   :  { %473 = vrcp.f32 %v333_v43  ;;  %v335_v44 = vpop.xlane.xlu0 %334 }
 0x2f6   :  { %357 = vst.msk [vmem:[%s610_s5 + $0x10] sm:$0xff] %vm354_vm1, %v343_v42  ;;  %475 = vrcp.f32 %v335_v44 }
 0x2f7   :  { %v466_v45 = vpop.eup %465 }
 0x2f8   :  { %v468_v46 = vpop.eup %467  ;;  %v345_v47 = vmul.f32 %v466_v45, %v452_v30  ;;  %v337_v48 = vpop.xlane.xlu1 %336 }
 0x2f9   :  { %v339_v49 = vmul.f32 %v468_v46, %v450_v28  ;;  %477 = vrcp.f32 %v337_v48 }
 0x2fa   :  { %358 = vst.msk [vmem:[%s610_s5 + $0x18] sm:$0xff] %vm354_vm1, %v345_v47 }
 0x2fb   :  { %v470_v50 = vpop.eup %469  ;;  %355 = vst.msk [vmem:[%s610_s5] sm:$0xff] %vm354_vm1, %v339_v49 }
 0x2fc   :  { %v472_v51 = vpop.eup %471  ;;  %v341_v52 = vmul.f32 %v470_v50, %v454_v31 }
 0x2fd   :  { %v347_v53 = vmul.f32 %v472_v51, %v456_v32 }
 0x2fe   :  { %356 = vst.msk [vmem:[%s610_s5 + $0x8] sm:$0xff] %vm354_vm1, %v341_v52 }
 0x2ff   :  { %v474_v54 = vpop.eup %473  ;;  %359 = vst.msk [vmem:[%s610_s5 + $0x20] sm:$0xff] %vm354_vm1, %v347_v53 }
 0x300   :  { %v476_v55 = vpop.eup %475  ;;  %v349_v56 = vmul.f32 %v474_v54, %v458_v33 }
 0x301   :  { %v351_v57 = vmul.f32 %v476_v55, %v460_v34 }
 0x302   :  { %360 = vst.msk [vmem:[%s610_s5 + $0x28] sm:$0xff] %vm354_vm1, %v349_v56 }
 0x303   :  { %v478_v58 = vpop.eup %477  ;;  %361 = vst.msk [vmem:[%s610_s5 + $0x30] sm:$0xff] %vm354_vm1, %v351_v57 }
 0x304   :  { %v353_v59 = vmul.f32 %v478_v58, %v462_v35 }
 0x306   :  { %362 = vst.msk [vmem:[%s610_s5 + $0x38] sm:$0xff] %vm354_vm1, %v353_v59 }

</bundles_post_ra>
